<compile_context>
chip_gen: v6e
topology: v6e:2x2x1
jax: 0.10.0
libtpu: 0.0.40
codegen_flags: <defaults>
</compile_context>

<pallas_src>
import functools

import jax
import jax.numpy as jnp
from jax.experimental import pallas as pl
from jax.experimental.pallas import tpu as pltpu

LANE = 128                      # lane granule on all generations
SUBLANE = 8
TB_MAX = 512                    # batch-tile cap (mem-bound sweep: 512 ~ 85% HBM roofline)
TILE_VMEM_BUDGET = 8 * 2**20    # budget for double-buffered x/out tiles


def _round_up(n, m):
    return ((n + m - 1) // m) * m


def _cdiv(a, b):
    return -(-a // b)


def mlp_kernel(x_ref, w1_ref, b1_ref, w2_ref, b2_ref, w3_ref, b3_ref, o_ref):
    # f32 -> bf16 cast of the activation tile happens in-kernel (VPU op hidden
    # under MXU/DMA) so the wrapper never re-materializes x in HBM.
    x = x_ref[...].astype(jnp.bfloat16)
    # Layer 1: bf16 MXU matmul, f32 accumulation; bias add + ReLU in f32 (VPU).
    h = jnp.dot(x, w1_ref[...], preferred_element_type=jnp.float32)
    h = jnp.maximum(h + b1_ref[...], 0.0)
    # Layer 2
    h = jnp.dot(h.astype(jnp.bfloat16), w2_ref[...],
                preferred_element_type=jnp.float32)
    h = jnp.maximum(h + b2_ref[...], 0.0)
    # Layer 3: logits, no activation (matches the PyTorch forward).
    h = jnp.dot(h.astype(jnp.bfloat16), w3_ref[...],
                preferred_element_type=jnp.float32)
    o_ref[...] = (h + b3_ref[...]).astype(o_ref.dtype)


def prepare_params(w1, b1, w2, b2, w3, b3):
    """One-time pad + bf16 cast of parameters (hoisted out of the forward path).

    Zero padding is semantics-preserving: padded weight rows/cols contribute 0,
    padded hidden/output lanes stay exactly 0 through bias-add and ReLU, and
    the padded logit columns are sliced off in the forward.
    """
    input_size, hidden_size = w1.shape
    num_classes = w3.shape[1]
    d_h = _round_up(hidden_size, LANE)
    d_out = _round_up(num_classes, LANE)
    f32, bf16 = jnp.float32, jnp.bfloat16
    # W1 stays UNPADDED along its first (contraction) dim so it matches the
    # unpadded x lane width; hidden/class dims are padded to 128 lanes so every
    # intermediate and the output store are lane-dense (unmasked vst).
    w1p = jnp.zeros((input_size, d_h), f32).at[:, :hidden_size].set(w1).astype(bf16)
    w2p = jnp.zeros((d_h, d_h), f32).at[:hidden_size, :hidden_size].set(w2).astype(bf16)
    w3p = jnp.zeros((d_h, d_out), f32).at[:hidden_size, :num_classes].set(w3).astype(bf16)
    b1p = jnp.zeros((1, d_h), f32).at[0, :hidden_size].set(b1)
    b2p = jnp.zeros((1, d_h), f32).at[0, :hidden_size].set(b2)
    b3p = jnp.zeros((1, d_out), f32).at[0, :num_classes].set(b3)
    return (w1p, b1p, w2p, b2p, w3p, b3p)


def _choose_batch_tile(batch, input_size, d_out):
    # Balanced tiling: minimize batch padding instead of a flat cap.
    n_tiles = max(1, _cdiv(batch, TB_MAX))
    # v7x: ensure >=2 grid steps for mid/large batches so both TensorCores get
    # work on the "parallel" axis (no effect on single-TC v5e/v6e).
    if batch > 256 and n_tiles < 2:
        n_tiles = 2
    tb = _round_up(_cdiv(batch, n_tiles), SUBLANE)
    # Keep double-buffered x (f32) + out (f32) tiles within a modest VMEM
    # budget so a large bag-of-words vocabulary never blows the scoped limit
    # on v5e (16 MiB default) / v7x (32 MiB default, 64 MiB physical).
    while tb > SUBLANE and 2 * tb * (input_size + d_out) * 4 > TILE_VMEM_BUDGET:
        tb = max(SUBLANE, _round_up(tb // 2, SUBLANE))
    return tb


@functools.partial(jax.jit, static_argnames=("num_classes",))
def neural_net_forward(x, params, *, num_classes):
    """x: [B, input_size] f32. params: output of prepare_params()."""
    w1p, b1p, w2p, b2p, w3p, b3p = params
    batch, input_size = x.shape
    d_h = w1p.shape[1]
    d_out = w3p.shape[1]

    tb = _choose_batch_tile(batch, input_size, d_out)
    b_pad = _round_up(batch, tb)
    if b_pad != batch:
        x = jnp.pad(x, ((0, b_pad - batch), (0, 0)))

    grid = (b_pad // tb,)

    # Weights/biases: constant index_map -> loaded once, stay VMEM-resident.
    def resident(a):
        return pl.BlockSpec(a.shape, lambda i: (0,) * a.ndim)

    flops = 2 * b_pad * (input_size * d_h + d_h * d_h + d_h * d_out)
    bytes_accessed = (
        b_pad * input_size * 4                              # f32 x read
        + (w1p.size + w2p.size + w3p.size) * 2              # bf16 weights
        + (b1p.size + b2p.size + b3p.size) * 4              # f32 biases
        + b_pad * d_out * 4                                 # f32 logits out
    )

    # Explicit VMEM budget: resident params + double-buffered x/out tiles.
    vmem_needed = (
        w1p.nbytes + w2p.nbytes + w3p.nbytes
        + b1p.nbytes + b2p.nbytes + b3p.nbytes
        + 2 * tb * input_size * 4
        + 2 * tb * d_out * 4
    )
    vmem_limit = int(min(64 * 2**20, max(32 * 2**20, 2 * vmem_needed)))

    out_padded = pl.pallas_call(
        mlp_kernel,
        out_shape=jax.ShapeDtypeStruct((b_pad, d_out), jnp.float32),
        grid=grid,
        in_specs=[
            # x block lane dim == full input_size (full-dim block is exempt
            # from the 128-lane rule): no feature padding / wrapper cast of x.
            pl.BlockSpec((tb, input_size), lambda i: (i, 0)),
            resident(w1p), resident(b1p),
            resident(w2p), resident(b2p),
            resident(w3p), resident(b3p),
        ],
        out_specs=pl.BlockSpec((tb, d_out), lambda i: (i, 0)),
        compiler_params=pltpu.CompilerParams(
            dimension_semantics=("parallel",),   # shard batch across TCs on v7x
            vmem_limit_bytes=vmem_limit,
        ),
        cost_estimate=pl.CostEstimate(
            flops=flops, transcendentals=0, bytes_accessed=bytes_accessed),
    )(x, w1p, b1p, w2p, b2p, w3p, b3p)

    # Logical logits (fused into the same jit as the kernel).
    return out_padded[:batch, :num_classes]


def init_params(key, input_size, hidden_size, num_classes):
    """Deterministic synthetic init (same shapes as nn.Linear, stored [in, out])."""
    k1, k2, k3, k4, k5, k6 = jax.random.split(key, 6)
    scale1 = 1.0 / jnp.sqrt(input_size)
    scale2 = 1.0 / jnp.sqrt(hidden_size)
    w1 = jax.random.uniform(k1, (input_size, hidden_size), jnp.float32, -scale1, scale1)
    b1 = jax.random.uniform(k2, (hidden_size,), jnp.float32, -scale1, scale1)
    w2 = jax.random.uniform(k3, (hidden_size, hidden_size), jnp.float32, -scale2, scale2)
    b2 = jax.random.uniform(k4, (hidden_size,), jnp.float32, -scale2, scale2)
    w3 = jax.random.uniform(k5, (hidden_size, num_classes), jnp.float32, -scale2, scale2)
    b3 = jax.random.uniform(k6, (num_classes,), jnp.float32, -scale2, scale2)
    return w1, b1, w2, b2, w3, b3


if __name__ == "__main__":
    # Small shapes consistent with the module: bag-of-words input -> hidden 16 -> tags
    batch = 8
    input_size = 32      # stand-in for len(all_words)
    hidden_size = 16
    num_classes = 8      # stand-in for number of intent tags

    key = jax.random.PRNGKey(0)
    kx, kp = jax.random.split(key)
    x = jax.random.uniform(kx, (batch, input_size), jnp.float32)  # bag-of-words-like
    w1, b1, w2, b2, w3, b3 = init_params(kp, input_size, hidden_size, num_classes)

    # One-time parameter pad + bf16 cast (cached across forward calls).
    params = prepare_params(w1, b1, w2, b2, w3, b3)

    out = neural_net_forward(x, params, num_classes=num_classes)
    out = jax.block_until_ready(out)

    # Reference check in plain JAX (f32; kernel uses bf16 matmul operands, so
    # tolerance is relaxed accordingly).
    ref = jnp.maximum(x @ w1 + b1, 0.0)
    ref = jnp.maximum(ref @ w2 + b2, 0.0)
    ref = ref @ w3 + b3
    assert out.shape == (batch, num_classes)
    assert jnp.allclose(out, ref, atol=5e-2, rtol=5e-2), (
        float(jnp.max(jnp.abs(out - ref))))

    print("KERNEL_OK")
</pallas_src>

<mosaic_0001>
module attributes {stable_mosaic.version = 11 : i64} {
  func.func @mlp_kernel(%arg0: i32, %arg1: memref<8x32xf32, #tpu.memory_space<vmem>>, %arg2: memref<32x128xbf16, #tpu.memory_space<vmem>>, %arg3: memref<1x128xf32, #tpu.memory_space<vmem>>, %arg4: memref<128x128xbf16, #tpu.memory_space<vmem>>, %arg5: memref<1x128xf32, #tpu.memory_space<vmem>>, %arg6: memref<128x128xbf16, #tpu.memory_space<vmem>>, %arg7: memref<1x128xf32, #tpu.memory_space<vmem>>, %arg8: memref<8x128xf32, #tpu.memory_space<vmem>>) attributes {dimension_semantics = [#tpu.dimension_semantics<parallel>], iteration_bounds = array<i64: 1>, scalar_prefetch = 0 : i64, scratch_operands = 0 : i64, tpu.core_type = #tpu.core_type<tc>, window_params = [{transform_indices = @transform_0, window_bounds = array<i64: 8, 32>}, {pipeline_mode = #tpu.pipeline_mode<synchronous>, transform_indices = @transform_1, window_bounds = array<i64: 32, 128>}, {pipeline_mode = #tpu.pipeline_mode<synchronous>, transform_indices = @transform_2, window_bounds = array<i64: 1, 128>}, {pipeline_mode = #tpu.pipeline_mode<synchronous>, transform_indices = @transform_3, window_bounds = array<i64: 128, 128>}, {pipeline_mode = #tpu.pipeline_mode<synchronous>, transform_indices = @transform_4, window_bounds = array<i64: 1, 128>}, {pipeline_mode = #tpu.pipeline_mode<synchronous>, transform_indices = @transform_5, window_bounds = array<i64: 128, 128>}, {pipeline_mode = #tpu.pipeline_mode<synchronous>, transform_indices = @transform_6, window_bounds = array<i64: 1, 128>}, {transform_indices = @transform_7, window_bounds = array<i64: 8, 128>}]} {
    %c0 = arith.constant 0 : index
    %c0_0 = arith.constant 0 : index
    %0 = vector.load %arg1[%c0, %c0_0] : memref<8x32xf32, #tpu.memory_space<vmem>>, vector<8x32xf32>
    %1 = arith.truncf %0 : vector<8x32xf32> to vector<8x32xbf16>
    %c0_1 = arith.constant 0 : index
    %c0_2 = arith.constant 0 : index
    %2 = vector.load %arg2[%c0_1, %c0_2] : memref<32x128xbf16, #tpu.memory_space<vmem>>, vector<32x128xbf16>
    %cst = arith.constant dense<0.000000e+00> : vector<8x128xf32>
    %3 = tpu.matmul %1, %2, %cst {dimension_numbers = #tpu.dot_dimension_numbers<[1], [0], [0], [1], [0, 0, 1, 1], [], []>} : vector<8x32xbf16>, vector<32x128xbf16>, vector<8x128xf32> -> vector<8x128xf32>
    %c0_3 = arith.constant 0 : index
    %c0_4 = arith.constant 0 : index
    %4 = vector.load %arg3[%c0_3, %c0_4] : memref<1x128xf32, #tpu.memory_space<vmem>>, vector<1x128xf32>
    %5 = vector.broadcast %4 : vector<1x128xf32> to vector<8x128xf32>
    %6 = arith.addf %3, %5 : vector<8x128xf32>
    %cst_5 = arith.constant 0.000000e+00 : f32
    %7 = vector.broadcast %cst_5 : f32 to vector<8x128xf32>
    %8 = arith.maximumf %6, %7 : vector<8x128xf32>
    %9 = arith.truncf %8 : vector<8x128xf32> to vector<8x128xbf16>
    %c0_6 = arith.constant 0 : index
    %c0_7 = arith.constant 0 : index
    %10 = vector.load %arg4[%c0_6, %c0_7] : memref<128x128xbf16, #tpu.memory_space<vmem>>, vector<128x128xbf16>
    %cst_8 = arith.constant dense<0.000000e+00> : vector<8x128xf32>
    %11 = tpu.matmul %9, %10, %cst_8 {dimension_numbers = #tpu.dot_dimension_numbers<[1], [0], [0], [1], [0, 0, 1, 1], [], []>} : vector<8x128xbf16>, vector<128x128xbf16>, vector<8x128xf32> -> vector<8x128xf32>
    %c0_9 = arith.constant 0 : index
    %c0_10 = arith.constant 0 : index
    %12 = vector.load %arg5[%c0_9, %c0_10] : memref<1x128xf32, #tpu.memory_space<vmem>>, vector<1x128xf32>
    %13 = vector.broadcast %12 : vector<1x128xf32> to vector<8x128xf32>
    %14 = arith.addf %11, %13 : vector<8x128xf32>
    %cst_11 = arith.constant 0.000000e+00 : f32
    %15 = vector.broadcast %cst_11 : f32 to vector<8x128xf32>
    %16 = arith.maximumf %14, %15 : vector<8x128xf32>
    %17 = arith.truncf %16 : vector<8x128xf32> to vector<8x128xbf16>
    %c0_12 = arith.constant 0 : index
    %c0_13 = arith.constant 0 : index
    %18 = vector.load %arg6[%c0_12, %c0_13] : memref<128x128xbf16, #tpu.memory_space<vmem>>, vector<128x128xbf16>
    %cst_14 = arith.constant dense<0.000000e+00> : vector<8x128xf32>
    %19 = tpu.matmul %17, %18, %cst_14 {dimension_numbers = #tpu.dot_dimension_numbers<[1], [0], [0], [1], [0, 0, 1, 1], [], []>} : vector<8x128xbf16>, vector<128x128xbf16>, vector<8x128xf32> -> vector<8x128xf32>
    %c0_15 = arith.constant 0 : index
    %c0_16 = arith.constant 0 : index
    %20 = vector.load %arg7[%c0_15, %c0_16] : memref<1x128xf32, #tpu.memory_space<vmem>>, vector<1x128xf32>
    %21 = vector.broadcast %20 : vector<1x128xf32> to vector<8x128xf32>
    %22 = arith.addf %19, %21 : vector<8x128xf32>
    %c0_17 = arith.constant 0 : index
    %c0_18 = arith.constant 0 : index
    %23 = vector.load %arg8[%c0_17, %c0_18] : memref<8x128xf32, #tpu.memory_space<vmem>>, vector<8x128xf32>
    tpu.vector_store %arg8[%c0_17, %c0_18], %22 {strides = array<i32>} : memref<8x128xf32, #tpu.memory_space<vmem>>, vector<8x128xf32>,
    return
  }
  func.func @transform_0(%arg0: i32) -> (i32, i32) {
    %c0_i32 = arith.constant 0 : i32
    %c0_i32_0 = arith.constant 0 : i32
    return %arg0, %c0_i32 : i32, i32
  }
  func.func @transform_1(%arg0: i32) -> (i32, i32) {
    %c0_i32 = arith.constant 0 : i32
    %c0_i32_0 = arith.constant 0 : i32
    %c0_i32_1 = arith.constant 0 : i32
    return %c0_i32, %c0_i32_0 : i32, i32
  }
  func.func @transform_2(%arg0: i32) -> (i32, i32) {
    %c0_i32 = arith.constant 0 : i32
    %c0_i32_0 = arith.constant 0 : i32
    %c0_i32_1 = arith.constant 0 : i32
    return %c0_i32, %c0_i32_0 : i32, i32
  }
  func.func @transform_3(%arg0: i32) -> (i32, i32) {
    %c0_i32 = arith.constant 0 : i32
    %c0_i32_0 = arith.constant 0 : i32
    %c0_i32_1 = arith.constant 0 : i32
    return %c0_i32, %c0_i32_0 : i32, i32
  }
  func.func @transform_4(%arg0: i32) -> (i32, i32) {
    %c0_i32 = arith.constant 0 : i32
    %c0_i32_0 = arith.constant 0 : i32
    %c0_i32_1 = arith.constant 0 : i32
    return %c0_i32, %c0_i32_0 : i32, i32
  }
  func.func @transform_5(%arg0: i32) -> (i32, i32) {
    %c0_i32 = arith.constant 0 : i32
    %c0_i32_0 = arith.constant 0 : i32
    %c0_i32_1 = arith.constant 0 : i32
    return %c0_i32, %c0_i32_0 : i32, i32
  }
  func.func @transform_6(%arg0: i32) -> (i32, i32) {
    %c0_i32 = arith.constant 0 : i32
    %c0_i32_0 = arith.constant 0 : i32
    %c0_i32_1 = arith.constant 0 : i32
    return %c0_i32, %c0_i32_0 : i32, i32
  }
  func.func @transform_7(%arg0: i32) -> (i32, i32) {
    %c0_i32 = arith.constant 0 : i32
    %c0_i32_0 = arith.constant 0 : i32
    return %arg0, %c0_i32 : i32, i32
  }
}

</mosaic_0001>

<bundles_post_ra>
// kernel: neural_net_forward.1
= control target key start
LH: loop header
LB: loop body
LE: loop exit
PB: predicated region body
PF: predicated region fallthrough
CT: control target
= control target key end

     0   :  { %12 = vsyncpa [#allocation3], 0  ;;  %s726_s0 = inlined_call_operand.hbm [shape: f32[8,32], index: 0, kind: input, shape index: {}]   ;;  %s727_s1 = inlined_call_operand.hbm [shape: bf16[32,128], index: 1, kind: input, shape index: {}]   ;;  %s728_s2 = inlined_call_operand.vmem [shape: f32[1,128], index: 2, kind: input, shape index: {}]   ;;  %s729_s3 = inlined_call_operand.hbm [shape: bf16[128,128], index: 3, kind: input, shape index: {}]   ;;  %s730_s4 = inlined_call_operand.vmem [shape: f32[1,128], index: 4, kind: input, shape index: {}]   ;;  %s731_s5 = inlined_call_operand.hbm [shape: bf16[128,128], index: 5, kind: input, shape index: {}]   ;;  %s732_s6 = inlined_call_operand.vmem [shape: f32[1,128], index: 6, kind: input, shape index: {}]   ;;  %s733_s7 = inlined_call_operand.hbm [shape: f32[8,128], index: 7, kind: output, shape index: {}]  }
   0x1   :  { %13 = vsyncpa [#allocation6], 0 }
   0x2   :  { %14 = vsyncpa [#allocation9], 0 }
   0x3   :  { %15 = vsyncpa [#allocation4], 0  ;;  %s620_s24 = smov [#allocation5]  }
   0x4   :  { %s31_s25 = sshll.u32 %s620_s24, 4  ;;  %s32_s25 = int_to_ptr.vmem [resolvable:$true] %s31_s25 }
   0x5   :  { %s520_s26 = scalar_lea.vmem %s32_s25, 256  ;;  %p525_p1 = scmp.lt.s32.totalorder %s32_s25, %s32_s25 }
   0x6   :  { %p521_p0 = scmp.ne.s32.totalorder %s32_s25, %s520_s26  ;;  %p526_p2 = scmp.lt.s32.totalorder %s520_s26, %s520_s26 }
   0x8   :  { %p527_p3 = por %p526_p2, %p525_p1 }
   0xa   :  { %p528_p4 = pnand %p527_p3, %p521_p0 }
   0xc   :  { %531 = shalt.err (!%p528_p4)
}
   0xd   :  { %s621_s27 = smov 64   ;;  %s622_s28 = smov 4  }
   0xe   :  { %37 = dma.hbm_to_vmem [thread:$0]  %s727_s1, 256, %s32_s25, [#allocation6], %s621_s27, %s621_s27, %s622_s28  }
   0xf   :  { %s623_s8 = smov [#allocation2]   ;;  %s624_s10 = smov [#allocation7]  }
  0x10   :  { %s22_s9 = sshll.u32 %s623_s8, 4  ;;  %s45_s11 = sshll.u32 %s624_s10, 4  ;;  %s23_s9 = int_to_ptr.vmem [resolvable:$true] %s22_s9  ;;  %s46_s11 = int_to_ptr.vmem [resolvable:$true] %s45_s11 }
  0x11   :  { %s540_s12 = scalar_lea.vmem %s23_s9, 128  ;;  %p545_p6 = scmp.lt.s32.totalorder %s23_s9, %s23_s9 }
  0x12   :  { %p541_p5 = scmp.ne.s32.totalorder %s23_s9, %s540_s12  ;;  %p546_p7 = scmp.lt.s32.totalorder %s540_s12, %s540_s12 }
  0x14   :  { %p547_p8 = por %p546_p7, %p545_p6 }
  0x16   :  { %p548_p9 = pnand %p547_p8, %p541_p5 }
  0x18   :  { %551 = shalt.err (!%p548_p9)
}
  0x19   :  { %25 = dma.hbm_to_vmem [thread:$0]  %s726_s0, 128, %s23_s9, [#allocation3]  }
  0x1a   :  { %s560_s15 = scalar_lea.vmem %s46_s11, 1024  ;;  %p565_p11 = scmp.lt.s32.totalorder %s46_s11, %s46_s11 }
  0x1b   :  { %p561_p10 = scmp.ne.s32.totalorder %s46_s11, %s560_s15  ;;  %p566_p12 = scmp.lt.s32.totalorder %s560_s15, %s560_s15 }
  0x1d   :  { %p567_p13 = por %p566_p12, %p565_p11 }
  0x1f   :  { %p568_p0 = pnand %p567_p13, %p561_p10 }
  0x21   :  { %571 = shalt.err (!%p568_p0)
}
  0x22   :  { %51 = dma.hbm_to_vmem [thread:$0]  %s729_s3, 1024, %s46_s11, [#allocation6], %s621_s27, %s621_s27, %s622_s28  }
  0x23   :  { %s625_s17 = smov [#allocation8]  }
  0x24   :  { %s59_s18 = sshll.u32 %s625_s17, 4  ;;  %s60_s18 = int_to_ptr.vmem [resolvable:$true] %s59_s18 }
  0x25   :  { %s580_s19 = scalar_lea.vmem %s60_s18, 1024  ;;  %p585_p2 = scmp.lt.s32.totalorder %s60_s18, %s60_s18 }
  0x26   :  { %p581_p1 = scmp.ne.s32.totalorder %s60_s18, %s580_s19  ;;  %p586_p3 = scmp.lt.s32.totalorder %s580_s19, %s580_s19 }
  0x28   :  { %p587_p4 = por %p586_p3, %p585_p2 }
  0x2a   :  { %p588_p5 = pnand %p587_p4, %p581_p1 }
  0x2c   :  { %591 = shalt.err (!%p588_p5)
}
  0x2d   :  { %65 = dma.hbm_to_vmem [thread:$0]  %s731_s5, 1024, %s60_s18, [#allocation9], %s621_s27, %s621_s27, %s622_s28  }
  0x2e   :  { %612 = dma.done.wait [#allocation3], 128  }
  0x2f   :  { %613 = vsyncadd [#allocation3], 4294967168 }
  0x30   :  { %614 = dma.done.wait [#allocation6], 1280  }
  0x31   :  { %615 = vsyncadd [#allocation6], 4294966016 }
  0x32   :  { %616 = dma.done.wait [#allocation9], 1024  }
  0x33   :  { %617 = vsyncadd [#allocation9], 4294966272  ;;  %v626_v0 = vmov 0.0   ;;  %vm627_vm0 = vmmov 0   ;;  %v494_v1 = vld [vmem:[#allocation5 + $0x8] sm:$0xff]   ;;  %v495_v2 = vld [vmem:[#allocation5] sm:$0xff]  }
  0x34   :  { %437 = vmatprep.subr.bf16.mxu0 %v626_v0  ;;  %441 = vmatprep.mubr.msk.bf16.mxu0 %vm627_vm0, %v626_v0  ;;  %v81_v3 = vld [vmem:[#allocation2] sm:$0xff]  ;;  %v496_v4 = vld [vmem:[#allocation7 + $0x38] sm:$0xff]   ;;  %v497_v6 = vld [vmem:[#allocation7 + $0x30] sm:$0xff]   ;;  %vm106_vm1 = vcmask 261120   ;;  %s628_s24 = smov [#allocation10]  }
  0x35   :  { %445 = vmatprep.subr.bf16.mxu1 %v626_v0  ;;  %461 = vmatprep.mubr.msk.bf16.mxu1 %vm627_vm0, %v626_v0  ;;  %v82_v5 = vpack.c.bf16 %v81_v3, %v81_v3  ;;  %v498_v7 = vld [vmem:[#allocation7 + $0x28] sm:$0xff]   ;;  %v499_v8 = vld [vmem:[#allocation7 + $0x20] sm:$0xff]   ;;  %v500_v9 = vld [vmem:[#allocation7 + $0x18] sm:$0xff]   ;;  %s383_s25 = sshll.u32 %s628_s24, 4  ;;  %s384_s25 = int_to_ptr.vmem [resolvable:$true] %s383_s25 }
  0x36   :  { %438 = vmatpush3.bf16.msra.mxu0 %v494_v1  ;;  %446 = vmatpush3.bf16.msra.mxu1 %v496_v4  ;;  %v501_v10 = vld [vmem:[#allocation7 + $0x10] sm:$0xff]   ;;  %v502_v11 = vld [vmem:[#allocation7 + $0x8] sm:$0xff]   ;;  %v503_v12 = vld [vmem:[#allocation7] sm:$0xff]   ;;  %p597_p7 = scmp.lt.s32.totalorder %s384_s25, %s384_s25 }
  0x37   :  { %439 = vmatprep.subr.bf16.mxu0 %v626_v0  ;;  %447 = vmatprep.subr.bf16.mxu1 %v626_v0  ;;  %v504_v13 = vld [vmem:[#allocation8 + $0x38] sm:$0xff]   ;;  %v505_v14 = vld [vmem:[#allocation8 + $0x30] sm:$0xff]   ;;  %v506_v15 = vld [vmem:[#allocation8 + $0x28] sm:$0xff]  }
  0x38   :  { %v507_v16 = vld [vmem:[#allocation8 + $0x20] sm:$0xff]   ;;  %v508_v17 = vld [vmem:[#allocation8 + $0x18] sm:$0xff]   ;;  %v509_v18 = vld [vmem:[#allocation8 + $0x10] sm:$0xff]  }
  0x39   :  { %v394_v19 = vld [vmem:[%s728_s2] ss:$0 sm:$0xff]  ;;  %v511_v28 = vld [vmem:[#allocation8] sm:$0xff]  }
  0x3a   :  { %440 = vmatpush3.bf16.msra.mxu0 %v495_v2  ;;  %448 = vmatpush3.bf16.msra.mxu1 %v497_v6  ;;  %v510_v27 = vld [vmem:[#allocation8 + $0x8] sm:$0xff]  }
  0x3b   :  { %465 = vmatprep.subr.bf16.mxu0 %v626_v0  ;;  %449 = vmatprep.subr.bf16.mxu1 %v626_v0  ;;  %v398_v29 = vld [vmem:[%s730_s4] ss:$0 sm:$0xff]  ;;  %s592_s4 = scalar_lea.vmem %s384_s25, 128 }
  0x3c   :  { %v407_v37 = vld [vmem:[%s732_s6] ss:$0 sm:$0xff]  ;;  %p593_p6 = scmp.ne.s32.totalorder %s384_s25, %s592_s4  ;;  %p598_p8 = scmp.lt.s32.totalorder %s592_s4, %s592_s4 }
  0x3d   :  { %442 = vmatmul.mubr.msk.bf16.vlgmr.msra.gmra.mxu0 %vm106_vm1, %v82_v5 }
  0x3e   :  { %481 = vmatprep.mubr.msk.bf16.mxu0 %vm627_vm0, %v626_v0  ;;  %450 = vmatpush3.bf16.msra.mxu1 %v498_v7  ;;  %p599_p9 = por %p598_p8, %p597_p7 }
  0x3f   :  { %451 = vmatprep.subr.bf16.mxu1 %v626_v0  ;;  %466 = vmatpush3.bf16.msra.mxu0 %v504_v13 }
  0x40   :  { %467 = vmatprep.subr.bf16.mxu0 %v626_v0  ;;  %p600_p10 = pnand %p599_p9, %p593_p6 }
  0x42   :  { %452 = vmatpush3.bf16.msra.mxu1 %v499_v8 }
  0x43   :  { %453 = vmatprep.subr.bf16.mxu1 %v626_v0  ;;  %468 = vmatpush3.bf16.msra.mxu0 %v505_v14 }
  0x44   :  { %469 = vmatprep.subr.bf16.mxu0 %v626_v0 }
  0x46   :  { %454 = vmatpush3.bf16.msra.mxu1 %v500_v9 }
  0x47   :  { %455 = vmatprep.subr.bf16.mxu1 %v626_v0  ;;  %470 = vmatpush3.bf16.msra.mxu0 %v506_v15 }
  0x48   :  { %471 = vmatprep.subr.bf16.mxu0 %v626_v0 }
  0x4a   :  { %456 = vmatpush3.bf16.msra.mxu1 %v501_v10 }
  0x4b   :  { %457 = vmatprep.subr.bf16.mxu1 %v626_v0  ;;  %472 = vmatpush3.bf16.msra.mxu0 %v507_v16 }
  0x4c   :  { %473 = vmatprep.subr.bf16.mxu0 %v626_v0 }
  0x4e   :  { %458 = vmatpush3.bf16.msra.mxu1 %v502_v11 }
  0x4f   :  { %459 = vmatprep.subr.bf16.mxu1 %v626_v0  ;;  %474 = vmatpush3.bf16.msra.mxu0 %v508_v17 }
  0x50   :  { %475 = vmatprep.subr.bf16.mxu0 %v626_v0 }
  0x52   :  { %460 = vmatpush3.bf16.msra.mxu1 %v503_v12 }
  0x53   :  { %476 = vmatpush3.bf16.msra.mxu0 %v509_v18 }
  0x54   :  { %477 = vmatprep.subr.bf16.mxu0 %v626_v0 }
  0x57   :  { %478 = vmatpush3.bf16.msra.mxu0 %v510_v27 }
  0x58   :  { %479 = vmatprep.subr.bf16.mxu0 %v626_v0 }
  0x5b   :  { %480 = vmatpush3.bf16.msra.mxu0 %v511_v28 }
  0xfd   :  { %v144_v20 = vpop.f32.mrf.mxu0 }
  0xfe   :  { %v145_v21 = vadd.f32 %v394_v19, %v144_v20 }
  0xff   :  { %v443_v22 = vpop.f32.mrf.mxu0 }
 0x100   :  { %v150_v23 = vmax.f32 %v145_v21, 0.0 }
 0x101   :  { %v147_v24 = vpop.f32.mrf.mxu0 }
 0x102   :  { %v151_v25 = vpack.c.bf16 %v150_v23, %v150_v23 }
 0x103   :  { %v444_v26 = vpop.f32.mrf.mxu0 }
 0x104   :  { %462 = vmatmul.mubr.bf16.vlgmr.msra.gmra.mxu1 %v151_v25 }
 0x1c4   :  { %v257_v30 = vpop.f32.mrf.mxu1 }
 0x1c5   :  { %v258_v31 = vadd.f32 %v398_v29, %v257_v30 }
 0x1c6   :  { %v463_v32 = vpop.f32.mrf.mxu1 }
 0x1c7   :  { %v263_v33 = vmax.f32 %v258_v31, 0.0 }
 0x1c8   :  { %v260_v34 = vpop.f32.mrf.mxu1 }
 0x1c9   :  { %v264_v35 = vpack.c.bf16 %v263_v33, %v263_v33 }
 0x1ca   :  { %v464_v36 = vpop.f32.mrf.mxu1 }
 0x1cb   :  { %482 = vmatmul.mubr.bf16.vlgmr.msra.gmra.mxu0 %v264_v35 }
 0x28b   :  { %v370_v38 = vpop.f32.mrf.mxu0 }
 0x28c   :  { %v371_v39 = vadd.f32 %v407_v37, %v370_v38 }
 0x28d   :  { %v483_v40 = vpop.f32.mrf.mxu0 }
 0x28e   :  { %376 = vst [vmem:[#allocation10] sm:$0xff] %v371_v39 }
 0x28f   :  { %v373_v41 = vpop.f32.mrf.mxu0 }
 0x290   :  { %603 = shalt.err (!%p600_p10)
}
 0x291   :  { %386 = dma.vmem_to_hbm [thread:$0]  %s384_s25, 128, %s733_s7, [#allocation4]   ;;  %v484_v42 = vpop.f32.mrf.mxu0 }
 0x292   :  { %618 = dma.done.wait [#allocation4], 128  }
 0x293   :  { %619 = vsyncadd [#allocation4], 4294967168 }
 0x294   :  { %390 = vsyncpa [#allocation3], 1 }
 0x295   :  { %391 = vsyncpa [#allocation6], 1 }
 0x296   :  { %392 = vsyncpa [#allocation9], 1 }
 0x297   :  { %393 = vsyncpa [#allocation4], 1 }

</bundles_post_ra>
